<compile_context>
chip_gen: v6e
topology: v6e:2x2x1
jax: 0.10.0
libtpu: 0.0.40
codegen_flags: <defaults>
</compile_context>

<pallas_src>
import functools

import jax
import jax.numpy as jnp
from jax import lax
from jax.experimental import pallas as pl
from jax.experimental.pallas import tpu as pltpu


def _build_tap_table(ks, dils, pads, off):
    """Map unique padded-window offset -> list of (branch, tap_index)."""
    taps = {}
    for b, (k, dil, pad) in enumerate(zip(ks, dils, pads)):
        for j in range(k):
            taps.setdefault(off - pad + j * dil, []).append((b, j))
    return taps


def _fused_block(x_ref, xl_ref, xr_ref, w_refs, wp_ref, xpad_ref, *,
                 C, L_T, P, OFF, H, n_lt, taps, use_bf16):
    """Depthwise (3 branches, de-duplicated taps) + stacked pointwise conv.

    Returns (x2d, fused), both (C, L_T) float32, for the current (n, l) tile.
    """
    x2d = x_ref[0].astype(jnp.float32)                            # (C, L_T)

    # --- stage the padded window in VMEM scratch -------------------------
    # Interior lives at a 128-aligned lane offset (unmasked stores); only the
    # tiny P-wide halos are unaligned.  Halos are zero only at sequence edges.
    xpad_ref[:, OFF:OFF + L_T] = x2d
    if P > 0:
        if n_lt == 1:
            xpad_ref[:, OFF - P:OFF] = jnp.zeros((C, P), jnp.float32)
            xpad_ref[:, OFF + L_T:OFF + L_T + P] = jnp.zeros((C, P), jnp.float32)
        else:
            li = pl.program_id(1)

            @pl.when(li == 0)
            def _():
                xpad_ref[:, OFF - P:OFF] = jnp.zeros((C, P), jnp.float32)

            @pl.when(li > 0)
            def _():
                xpad_ref[:, OFF - P:OFF] = xl_ref[0, :, H - P:H].astype(jnp.float32)

            @pl.when(li == n_lt - 1)
            def _():
                xpad_ref[:, OFF + L_T:OFF + L_T + P] = jnp.zeros((C, P), jnp.float32)

            @pl.when(li < n_lt - 1)
            def _():
                xpad_ref[:, OFF + L_T:OFF + L_T + P] = xr_ref[0, :, :P].astype(jnp.float32)

    # --- depthwise taps: one load per UNIQUE offset, FMA into each branch --
    ws = [w_ref[...].astype(jnp.float32) for w_ref in w_refs]     # (C, k_b)
    accs = [jnp.zeros((C, L_T), jnp.float32) for _ in range(3)]
    for off in sorted(taps):
        win = xpad_ref[:, off:off + L_T]                          # (C, L_T) f32
        for (b, j) in taps[off]:
            accs[b] = accs[b] + win * ws[b][:, j:j + 1]

    # --- pointwise 1x1 conv: one stacked (C,3C)x(3C,L_T) contraction --------
    wp = wp_ref[...].astype(jnp.float32)                          # (C, 3C)
    if C >= 8:
        mdt = jnp.bfloat16 if use_bf16 else jnp.float32
        acc_stack = jnp.concatenate(accs, axis=0).astype(mdt)     # (3C, L_T)
        fused = lax.dot_general(wp.astype(mdt), acc_stack,
                                (((1,), (0,)), ((), ())),
                                preferred_element_type=jnp.float32)
    else:
        # Tiny C: small VPU accumulate (no MXU padding needed).
        fused = jnp.zeros((C, L_T), jnp.float32)
        for b in range(3):
            for c in range(C):
                fused = fused + wp[:, b * C + c:b * C + c + 1] * accs[b][c:c + 1, :]
    return x2d, fused


def _stats_kernel(x_ref, xl_ref, xr_ref, w1_ref, w2_ref, w3_ref, wp_ref,
                  sum_ref, sumsq_ref, xpad_ref, *,
                  L, C, L_T, P, OFF, H, n_lt, taps, use_bf16):
    _, fused = _fused_block(x_ref, xl_ref, xr_ref, (w1_ref, w2_ref, w3_ref),
                            wp_ref, xpad_ref, C=C, L_T=L_T, P=P, OFF=OFF, H=H,
                            n_lt=n_lt, taps=taps, use_bf16=use_bf16)
    if n_lt * L_T != L:
        # Ragged last tile: exclude padded columns from the BN statistics.
        col = (pl.program_id(1) * L_T
               + lax.broadcasted_iota(jnp.int32, (1, L_T), 1))
        fused = jnp.where(col < L, fused, 0.0)
    # Lane-dense partial stats: C on lanes -> unmasked stores.
    sum_ref[...] = jnp.sum(fused, axis=-1).reshape(1, 1, 1, C)
    sumsq_ref[...] = jnp.sum(fused * fused, axis=-1).reshape(1, 1, 1, C)


def _apply_kernel(x_ref, xl_ref, xr_ref, w1_ref, w2_ref, w3_ref, wp_ref,
                  scale_ref, shift_ref, out_ref, xpad_ref, *,
                  C, L_T, P, OFF, H, n_lt, taps, use_bf16):
    x2d, fused = _fused_block(x_ref, xl_ref, xr_ref, (w1_ref, w2_ref, w3_ref),
                              wp_ref, xpad_ref, C=C, L_T=L_T, P=P, OFF=OFF,
                              H=H, n_lt=n_lt, taps=taps, use_bf16=use_bf16)
    attn = jax.nn.sigmoid(fused * scale_ref[...] + shift_ref[...])
    out_ref[...] = (x2d * attn)[None].astype(out_ref.dtype)


def mlka_forward(x, w1, w2, w3, wp, gamma, beta, kernel_sizes, dilation,
                 *, l_tile=None, use_bf16_mxu=True):
    N, C, L = x.shape
    k1, k2, k3 = kernel_sizes
    # Odd kernels assumed (k//2 padding preserves length, matching PyTorch).
    assert all(k % 2 == 1 for k in kernel_sizes)
    p1 = k1 // 2
    p2 = (k2 // 2) * dilation
    p3 = (k3 // 2) * dilation
    P = max(p1, p2, p3)
    assert P <= 128, "conv halo wider than one 128-lane block is unsupported"
    eps = 1e-5

    # --- VMEM budget & L tile selection (generation-aware) ----------------
    try:
        vmem_cap = int(pltpu.get_tpu_info().vmem_capacity_bytes)
        vmem_limit = max(32 * 1024 * 1024, int(0.6 * vmem_cap))
    except Exception:  # CPU / interpret / older runtime: v7x-safe default.
        vmem_limit = 32 * 1024 * 1024

    if l_tile is None:
        # ~12 live (C, L_T) f32 slabs per grid step (x/out double-buffered,
        # xpad scratch, 3 branch accumulators, stacked operand, temporaries).
        budget = min(vmem_limit // 2, 24 * 1024 * 1024)
        t = budget // (12 * C * 4)
        l_tile = max(128, min((t // 128) * 128, 4096))

    if L <= l_tile:
        L_T, n_lt, L_r = L, 1, L           # single tile: block == full length
    else:
        assert l_tile % 128 == 0, "l_tile must be a multiple of 128 when tiling"
        L_T = l_tile
        n_lt = -(-L // L_T)                # cdiv
        L_r = n_lt * L_T

    # Zero-pad only the ragged tail (keeps conv 'same' semantics at the edge).
    x_w = x if L_r == L else jnp.pad(x, ((0, 0), (0, 0), (0, L_r - L)))

    OFF = 128 if P > 0 else 0              # 128-aligned interior offset in xpad
    H = min(128, L_r)                      # halo block width (read iff n_lt > 1)
    nb128 = max(L_r // H, 1)
    tpb = (L_T // H) if n_lt > 1 else 1    # 128-blocks per L tile

    taps = _build_tap_table((k1, k2, k3), (1, dilation, dilation),
                            (p1, p2, p3), OFF)

    kern_kwargs = dict(C=C, L_T=L_T, P=P, OFF=OFF, H=H, n_lt=n_lt, taps=taps,
                       use_bf16=use_bf16_mxu)

    x_spec = pl.BlockSpec((1, C, L_T), lambda n, l: (n, 0, l))
    xl_spec = pl.BlockSpec(
        (1, C, H), lambda n, l: (n, 0, jnp.maximum(l * tpb - 1, 0)))
    xr_spec = pl.BlockSpec(
        (1, C, H), lambda n, l: (n, 0, jnp.minimum((l + 1) * tpb, nb128 - 1)))
    w_specs = [
        pl.BlockSpec((C, k1), lambda n, l: (0, 0)),
        pl.BlockSpec((C, k2), lambda n, l: (0, 0)),
        pl.BlockSpec((C, k3), lambda n, l: (0, 0)),
        pl.BlockSpec((C, 3 * C), lambda n, l: (0, 0)),
    ]
    scratch = [pltpu.VMEM((C, L_T + 2 * OFF), jnp.float32)]
    cparams = pltpu.CompilerParams(
        dimension_semantics=("parallel", "parallel"),
        vmem_limit_bytes=vmem_limit,
    )

    # ---- Pass 1: per-(batch, L-tile) partial BN statistics ----------------
    stat_spec = pl.BlockSpec((1, 1, 1, C), lambda n, l: (n, l, 0, 0))
    psum, psumsq = pl.pallas_call(
        functools.partial(_stats_kernel, L=L, **kern_kwargs),
        grid=(N, n_lt),
        in_specs=[x_spec, xl_spec, xr_spec] + w_specs,
        out_specs=[stat_spec, stat_spec],
        out_shape=[jax.ShapeDtypeStruct((N, n_lt, 1, C), jnp.float32)] * 2,
        scratch_shapes=scratch,
        compiler_params=cparams,
    )(x_w, x_w, x_w, w1, w2, w3, wp)

    # Tiny cross-tile BN finalisation in plain JAX (training-mode batch stats,
    # biased variance — as nn.BatchNorm1d does in training).
    # TODO(synk): E[x^2]-E[x]^2 can cancel for large-mean features; fused
    # features here are near zero-mean so f32 is adequate.
    cnt = float(N * L)
    mean = jnp.sum(psum, axis=(0, 1, 2)) / cnt                   # (C,)
    mean_sq = jnp.sum(psumsq, axis=(0, 1, 2)) / cnt
    var = jnp.maximum(mean_sq - mean * mean, 0.0)
    inv = lax.rsqrt(var + eps)
    g = gamma.reshape(C).astype(jnp.float32)
    b = beta.reshape(C).astype(jnp.float32)
    scale = (g * inv).reshape(C, 1)                              # (C, 1)
    shift = (b - g * inv * mean).reshape(C, 1)                   # (C, 1)

    # ---- Pass 2: recompute fused per tile and apply the sigmoid gate -------
    out = pl.pallas_call(
        functools.partial(_apply_kernel, **kern_kwargs),
        grid=(N, n_lt),
        in_specs=[x_spec, xl_spec, xr_spec] + w_specs + [
            pl.BlockSpec((C, 1), lambda n, l: (0, 0)),
            pl.BlockSpec((C, 1), lambda n, l: (0, 0)),
        ],
        out_specs=pl.BlockSpec((1, C, L_T), lambda n, l: (n, 0, l)),
        out_shape=jax.ShapeDtypeStruct((N, C, L_r), x.dtype),
        scratch_shapes=scratch,
        compiler_params=cparams,
    )(x_w, x_w, x_w, w1, w2, w3, wp, scale, shift)
    return out if L_r == L else out[:, :, :L]


def mlka_reference(x, w1, w2, w3, wp, gamma, beta, kernel_sizes, dilation):
    """Pure-JAX reference (lax conv) for correctness checking."""
    C = x.shape[1]

    def dw(x, w, k, dil, pad):
        return lax.conv_general_dilated(
            x, w.reshape(C, 1, k), window_strides=(1,),
            padding=[(pad, pad)], rhs_dilation=(dil,),
            dimension_numbers=('NCH', 'OIH', 'NCH'),
            feature_group_count=C)

    k1, k2, k3 = kernel_sizes
    x1 = dw(x, w1, k1, 1, k1 // 2)
    x2 = dw(x, w2, k2, dilation, (k2 // 2) * dilation)
    x3 = dw(x, w3, k3, dilation, (k3 // 2) * dilation)
    ms = jnp.concatenate([x1, x2, x3], axis=1)
    fused = jnp.einsum('oc,ncl->nol', wp, ms)
    mean = jnp.mean(fused, axis=(0, 2), keepdims=True)
    var = jnp.mean((fused - mean) ** 2, axis=(0, 2), keepdims=True)
    normed = (fused - mean) / jnp.sqrt(var + 1e-5)
    normed = normed * gamma + beta
    return x * jax.nn.sigmoid(normed)


def _make_case(key, N, C, L, kernel_sizes):
    kx, ka, kb, kc, kp = jax.random.split(key, 5)
    x = jax.random.normal(kx, (N, C, L), dtype=jnp.float32)
    # PyTorch shapes: (C,1,k) depthwise, (C,3C,1) pointwise — squeezed to 2D.
    w1 = 0.3 * jax.random.normal(ka, (C, kernel_sizes[0]), dtype=jnp.float32)
    w2 = 0.3 * jax.random.normal(kb, (C, kernel_sizes[1]), dtype=jnp.float32)
    w3 = 0.3 * jax.random.normal(kc, (C, kernel_sizes[2]), dtype=jnp.float32)
    wp = 0.3 * jax.random.normal(kp, (C, 3 * C), dtype=jnp.float32)
    gamma = jnp.ones((1, C, 1), dtype=jnp.float32)   # BN weight init = 1
    beta = jnp.zeros((1, C, 1), dtype=jnp.float32)   # BN bias init = 0
    return x, w1, w2, w3, wp, gamma, beta


if __name__ == "__main__":
    key = jax.random.PRNGKey(0)
    k_small, k_big = jax.random.split(key)
    kernel_sizes = (3, 5, 7)
    dilation = 2

    # Case 1: tiny shapes (module-consistent), single L tile, C<8 VPU path.
    args = _make_case(k_small, 2, 4, 16, kernel_sizes)
    out = mlka_forward(*args, kernel_sizes, dilation)
    out = jax.block_until_ready(out)
    ref = mlka_reference(*args, kernel_sizes, dilation)
    assert out.shape == (2, 4, 16)
    assert jnp.allclose(out, ref, atol=1e-4, rtol=1e-4), (
        f"case1 max abs err {jnp.max(jnp.abs(out - ref))}")

    # Case 2: multi-tile L (ragged tail), C>=8 stacked bf16 MXU path.
    # bf16 matmul operands (f32 accumulation) => looser tolerance vs f32 ref.
    args = _make_case(k_big, 2, 64, 300, kernel_sizes)
    out = mlka_forward(*args, kernel_sizes, dilation,
                       l_tile=128, use_bf16_mxu=True)
    out = jax.block_until_ready(out)
    ref = mlka_reference(*args, kernel_sizes, dilation)
    assert out.shape == (2, 64, 300)
    assert jnp.allclose(out, ref, atol=2e-2, rtol=2e-2), (
        f"case2 max abs err {jnp.max(jnp.abs(out - ref))}")

    print("KERNEL_OK")
</pallas_src>

<mosaic_0001>
module attributes {stable_mosaic.version = 11 : i64} {
  func.func @_stats_kernel(%arg0: i32, %arg1: i32, %arg2: memref<1x4x16xf32, #tpu.memory_space<vmem>>, %arg3: memref<1x4x16xf32, #tpu.memory_space<vmem>>, %arg4: memref<1x4x16xf32, #tpu.memory_space<vmem>>, %arg5: memref<4x3xf32, #tpu.memory_space<vmem>>, %arg6: memref<4x5xf32, #tpu.memory_space<vmem>>, %arg7: memref<4x7xf32, #tpu.memory_space<vmem>>, %arg8: memref<4x12xf32, #tpu.memory_space<vmem>>, %arg9: memref<1x1x1x4xf32, #tpu.memory_space<vmem>>, %arg10: memref<1x1x1x4xf32, #tpu.memory_space<vmem>>, %arg11: memref<4x272xf32, #tpu.memory_space<vmem>>) attributes {dimension_semantics = [#tpu.dimension_semantics<parallel>, #tpu.dimension_semantics<parallel>], iteration_bounds = array<i64: 2, 1>, scalar_prefetch = 0 : i64, scratch_operands = 1 : i64, tpu.core_type = #tpu.core_type<tc>, window_params = [{transform_indices = @transform_0, window_bounds = array<i64: 1, 4, 16>}, {transform_indices = @transform_1, window_bounds = array<i64: 1, 4, 16>}, {transform_indices = @transform_2, window_bounds = array<i64: 1, 4, 16>}, {pipeline_mode = #tpu.pipeline_mode<synchronous>, transform_indices = @transform_3, window_bounds = array<i64: 4, 3>}, {pipeline_mode = #tpu.pipeline_mode<synchronous>, transform_indices = @transform_4, window_bounds = array<i64: 4, 5>}, {pipeline_mode = #tpu.pipeline_mode<synchronous>, transform_indices = @transform_5, window_bounds = array<i64: 4, 7>}, {pipeline_mode = #tpu.pipeline_mode<synchronous>, transform_indices = @transform_6, window_bounds = array<i64: 4, 12>}, {transform_indices = @transform_7, window_bounds = array<i64: 1, 1, 1, 4>}, {transform_indices = @transform_8, window_bounds = array<i64: 1, 1, 1, 4>}]} {
    %c0 = arith.constant 0 : index
    %c0_0 = arith.constant 0 : index
    %c0_1 = arith.constant 0 : index
    %0 = vector.load %arg2[%c0, %c0_0, %c0_1] : memref<1x4x16xf32, #tpu.memory_space<vmem>>, vector<1x4x16xf32>
    %1 = vector.shape_cast %0 : vector<1x4x16xf32> to vector<4x16xf32>
    %c0_2 = arith.constant 0 : index
    %c128 = arith.constant 128 : index
    %2 = vector.load %arg11[%c0_2, %c128] : memref<4x272xf32, #tpu.memory_space<vmem>>, vector<4x16xf32>
    tpu.vector_store %arg11[%c0_2, %c128], %1 {strides = array<i32>} : memref<4x272xf32, #tpu.memory_space<vmem>>, vector<4x16xf32>,
    %cst = arith.constant 0.000000e+00 : f32
    %3 = vector.broadcast %cst : f32 to vector<4x6xf32>
    %c0_3 = arith.constant 0 : index
    %c122 = arith.constant 122 : index
    %4 = vector.load %arg11[%c0_3, %c122] : memref<4x272xf32, #tpu.memory_space<vmem>>, vector<4x6xf32>
    tpu.vector_store %arg11[%c0_3, %c122], %3 {strides = array<i32>} : memref<4x272xf32, #tpu.memory_space<vmem>>, vector<4x6xf32>,
    %cst_4 = arith.constant 0.000000e+00 : f32
    %5 = vector.broadcast %cst_4 : f32 to vector<4x6xf32>
    %c0_5 = arith.constant 0 : index
    %c144 = arith.constant 144 : index
    %6 = vector.load %arg11[%c0_5, %c144] : memref<4x272xf32, #tpu.memory_space<vmem>>, vector<4x6xf32>
    tpu.vector_store %arg11[%c0_5, %c144], %5 {strides = array<i32>} : memref<4x272xf32, #tpu.memory_space<vmem>>, vector<4x6xf32>,
    %c0_6 = arith.constant 0 : index
    %c0_7 = arith.constant 0 : index
    %7 = vector.load %arg5[%c0_6, %c0_7] : memref<4x3xf32, #tpu.memory_space<vmem>>, vector<4x3xf32>
    %c0_8 = arith.constant 0 : index
    %c0_9 = arith.constant 0 : index
    %8 = vector.load %arg6[%c0_8, %c0_9] : memref<4x5xf32, #tpu.memory_space<vmem>>, vector<4x5xf32>
    %c0_10 = arith.constant 0 : index
    %c0_11 = arith.constant 0 : index
    %9 = vector.load %arg7[%c0_10, %c0_11] : memref<4x7xf32, #tpu.memory_space<vmem>>, vector<4x7xf32>
    %cst_12 = arith.constant 0.000000e+00 : f32
    %10 = vector.broadcast %cst_12 : f32 to vector<4x16xf32>
    %cst_13 = arith.constant 0.000000e+00 : f32
    %11 = vector.broadcast %cst_13 : f32 to vector<4x16xf32>
    %cst_14 = arith.constant 0.000000e+00 : f32
    %12 = vector.broadcast %cst_14 : f32 to vector<4x16xf32>
    %c0_15 = arith.constant 0 : index
    %c122_16 = arith.constant 122 : index
    %13 = vector.load %arg11[%c0_15, %c122_16] : memref<4x272xf32, #tpu.memory_space<vmem>>, vector<4x16xf32>
    %14 = vector.extract_strided_slice %9 {offsets = [0, 0], sizes = [4, 1], strides = [1, 1]} : vector<4x7xf32> to vector<4x1xf32>
    %15 = vector.broadcast %14 : vector<4x1xf32> to vector<4x16xf32>
    %16 = arith.mulf %13, %15 : vector<4x16xf32>
    %17 = arith.addf %12, %16 : vector<4x16xf32>
    %c0_17 = arith.constant 0 : index
    %c124 = arith.constant 124 : index
    %18 = vector.load %arg11[%c0_17, %c124] : memref<4x272xf32, #tpu.memory_space<vmem>>, vector<4x16xf32>
    %19 = vector.extract_strided_slice %8 {offsets = [0, 0], sizes = [4, 1], strides = [1, 1]} : vector<4x5xf32> to vector<4x1xf32>
    %20 = vector.broadcast %19 : vector<4x1xf32> to vector<4x16xf32>
    %21 = arith.mulf %18, %20 : vector<4x16xf32>
    %22 = arith.addf %11, %21 : vector<4x16xf32>
    %23 = vector.extract_strided_slice %9 {offsets = [0, 1], sizes = [4, 1], strides = [1, 1]} : vector<4x7xf32> to vector<4x1xf32>
    %24 = vector.broadcast %23 : vector<4x1xf32> to vector<4x16xf32>
    %25 = arith.mulf %18, %24 : vector<4x16xf32>
    %26 = arith.addf %17, %25 : vector<4x16xf32>
    %c0_18 = arith.constant 0 : index
    %c126 = arith.constant 126 : index
    %27 = vector.load %arg11[%c0_18, %c126] : memref<4x272xf32, #tpu.memory_space<vmem>>, vector<4x16xf32>
    %28 = vector.extract_strided_slice %8 {offsets = [0, 1], sizes = [4, 1], strides = [1, 1]} : vector<4x5xf32> to vector<4x1xf32>
    %29 = vector.broadcast %28 : vector<4x1xf32> to vector<4x16xf32>
    %30 = arith.mulf %27, %29 : vector<4x16xf32>
    %31 = arith.addf %22, %30 : vector<4x16xf32>
    %32 = vector.extract_strided_slice %9 {offsets = [0, 2], sizes = [4, 1], strides = [1, 1]} : vector<4x7xf32> to vector<4x1xf32>
    %33 = vector.broadcast %32 : vector<4x1xf32> to vector<4x16xf32>
    %34 = arith.mulf %27, %33 : vector<4x16xf32>
    %35 = arith.addf %26, %34 : vector<4x16xf32>
    %c0_19 = arith.constant 0 : index
    %c127 = arith.constant 127 : index
    %36 = vector.load %arg11[%c0_19, %c127] : memref<4x272xf32, #tpu.memory_space<vmem>>, vector<4x16xf32>
    %37 = vector.extract_strided_slice %7 {offsets = [0, 0], sizes = [4, 1], strides = [1, 1]} : vector<4x3xf32> to vector<4x1xf32>
    %38 = vector.broadcast %37 : vector<4x1xf32> to vector<4x16xf32>
    %39 = arith.mulf %36, %38 : vector<4x16xf32>
    %40 = arith.addf %10, %39 : vector<4x16xf32>
    %c0_20 = arith.constant 0 : index
    %c128_21 = arith.constant 128 : index
    %41 = vector.load %arg11[%c0_20, %c128_21] : memref<4x272xf32, #tpu.memory_space<vmem>>, vector<4x16xf32>
    %42 = vector.extract_strided_slice %7 {offsets = [0, 1], sizes = [4, 1], strides = [1, 1]} : vector<4x3xf32> to vector<4x1xf32>
    %43 = vector.broadcast %42 : vector<4x1xf32> to vector<4x16xf32>
    %44 = arith.mulf %41, %43 : vector<4x16xf32>
    %45 = arith.addf %40, %44 : vector<4x16xf32>
    %46 = vector.extract_strided_slice %8 {offsets = [0, 2], sizes = [4, 1], strides = [1, 1]} : vector<4x5xf32> to vector<4x1xf32>
    %47 = vector.broadcast %46 : vector<4x1xf32> to vector<4x16xf32>
    %48 = arith.mulf %41, %47 : vector<4x16xf32>
    %49 = arith.addf %31, %48 : vector<4x16xf32>
    %50 = vector.extract_strided_slice %9 {offsets = [0, 3], sizes = [4, 1], strides = [1, 1]} : vector<4x7xf32> to vector<4x1xf32>
    %51 = vector.broadcast %50 : vector<4x1xf32> to vector<4x16xf32>
    %52 = arith.mulf %41, %51 : vector<4x16xf32>
    %53 = arith.addf %35, %52 : vector<4x16xf32>
    %c0_22 = arith.constant 0 : index
    %c129 = arith.constant 129 : index
    %54 = vector.load %arg11[%c0_22, %c129] : memref<4x272xf32, #tpu.memory_space<vmem>>, vector<4x16xf32>
    %55 = vector.extract_strided_slice %7 {offsets = [0, 2], sizes = [4, 1], strides = [1, 1]} : vector<4x3xf32> to vector<4x1xf32>
    %56 = vector.broadcast %55 : vector<4x1xf32> to vector<4x16xf32>
    %57 = arith.mulf %54, %56 : vector<4x16xf32>
    %58 = arith.addf %45, %57 : vector<4x16xf32>
    %c0_23 = arith.constant 0 : index
    %c130 = arith.constant 130 : index
    %59 = vector.load %arg11[%c0_23, %c130] : memref<4x272xf32, #tpu.memory_space<vmem>>, vector<4x16xf32>
    %60 = vector.extract_strided_slice %8 {offsets = [0, 3], sizes = [4, 1], strides = [1, 1]} : vector<4x5xf32> to vector<4x1xf32>
    %61 = vector.broadcast %60 : vector<4x1xf32> to vector<4x16xf32>
    %62 = arith.mulf %59, %61 : vector<4x16xf32>
    %63 = arith.addf %49, %62 : vector<4x16xf32>
    %64 = vector.extract_strided_slice %9 {offsets = [0, 4], sizes = [4, 1], strides = [1, 1]} : vector<4x7xf32> to vector<4x1xf32>
    %65 = vector.broadcast %64 : vector<4x1xf32> to vector<4x16xf32>
    %66 = arith.mulf %59, %65 : vector<4x16xf32>
    %67 = arith.addf %53, %66 : vector<4x16xf32>
    %c0_24 = arith.constant 0 : index
    %c132 = arith.constant 132 : index
    %68 = vector.load %arg11[%c0_24, %c132] : memref<4x272xf32, #tpu.memory_space<vmem>>, vector<4x16xf32>
    %69 = vector.extract_strided_slice %8 {offsets = [0, 4], sizes = [4, 1], strides = [1, 1]} : vector<4x5xf32> to vector<4x1xf32>
    %70 = vector.broadcast %69 : vector<4x1xf32> to vector<4x16xf32>
    %71 = arith.mulf %68, %70 : vector<4x16xf32>
    %72 = arith.addf %63, %71 : vector<4x16xf32>
    %73 = vector.extract_strided_slice %9 {offsets = [0, 5], sizes = [4, 1], strides = [1, 1]} : vector<4x7xf32> to vector<4x1xf32>
    %74 = vector.broadcast %73 : vector<4x1xf32> to vector<4x16xf32>
    %75 = arith.mulf %68, %74 : vector<4x16xf32>
    %76 = arith.addf %67, %75 : vector<4x16xf32>
    %c0_25 = arith.constant 0 : index
    %c134 = arith.constant 134 : index
    %77 = vector.load %arg11[%c0_25, %c134] : memref<4x272xf32, #tpu.memory_space<vmem>>, vector<4x16xf32>
    %78 = vector.extract_strided_slice %9 {offsets = [0, 6], sizes = [4, 1], strides = [1, 1]} : vector<4x7xf32> to vector<4x1xf32>
    %79 = vector.broadcast %78 : vector<4x1xf32> to vector<4x16xf32>
    %80 = arith.mulf %77, %79 : vector<4x16xf32>
    %81 = arith.addf %76, %80 : vector<4x16xf32>
    %c0_26 = arith.constant 0 : index
    %c0_27 = arith.constant 0 : index
    %82 = vector.load %arg8[%c0_26, %c0_27] : memref<4x12xf32, #tpu.memory_space<vmem>>, vector<4x12xf32>
    %cst_28 = arith.constant 0.000000e+00 : f32
    %83 = vector.broadcast %cst_28 : f32 to vector<4x16xf32>
    %84 = vector.extract_strided_slice %82 {offsets = [0, 0], sizes = [4, 1], strides = [1, 1]} : vector<4x12xf32> to vector<4x1xf32>
    %85 = vector.extract_strided_slice %58 {offsets = [0, 0], sizes = [1, 16], strides = [1, 1]} : vector<4x16xf32> to vector<1x16xf32>
    %86 = vector.broadcast %84 : vector<4x1xf32> to vector<4x16xf32>
    %87 = vector.broadcast %85 : vector<1x16xf32> to vector<4x16xf32>
    %88 = arith.mulf %86, %87 : vector<4x16xf32>
    %89 = arith.addf %83, %88 : vector<4x16xf32>
    %90 = vector.extract_strided_slice %82 {offsets = [0, 1], sizes = [4, 1], strides = [1, 1]} : vector<4x12xf32> to vector<4x1xf32>
    %91 = vector.extract_strided_slice %58 {offsets = [1, 0], sizes = [1, 16], strides = [1, 1]} : vector<4x16xf32> to vector<1x16xf32>
    %92 = vector.broadcast %90 : vector<4x1xf32> to vector<4x16xf32>
    %93 = vector.broadcast %91 : vector<1x16xf32> to vector<4x16xf32>
    %94 = arith.mulf %92, %93 : vector<4x16xf32>
    %95 = arith.addf %89, %94 : vector<4x16xf32>
    %96 = vector.extract_strided_slice %82 {offsets = [0, 2], sizes = [4, 1], strides = [1, 1]} : vector<4x12xf32> to vector<4x1xf32>
    %97 = vector.extract_strided_slice %58 {offsets = [2, 0], sizes = [1, 16], strides = [1, 1]} : vector<4x16xf32> to vector<1x16xf32>
    %98 = vector.broadcast %96 : vector<4x1xf32> to vector<4x16xf32>
    %99 = vector.broadcast %97 : vector<1x16xf32> to vector<4x16xf32>
    %100 = arith.mulf %98, %99 : vector<4x16xf32>
    %101 = arith.addf %95, %100 : vector<4x16xf32>
    %102 = vector.extract_strided_slice %82 {offsets = [0, 3], sizes = [4, 1], strides = [1, 1]} : vector<4x12xf32> to vector<4x1xf32>
    %103 = vector.extract_strided_slice %58 {offsets = [3, 0], sizes = [1, 16], strides = [1, 1]} : vector<4x16xf32> to vector<1x16xf32>
    %104 = vector.broadcast %102 : vector<4x1xf32> to vector<4x16xf32>
    %105 = vector.broadcast %103 : vector<1x16xf32> to vector<4x16xf32>
    %106 = arith.mulf %104, %105 : vector<4x16xf32>
    %107 = arith.addf %101, %106 : vector<4x16xf32>
    %108 = vector.extract_strided_slice %82 {offsets = [0, 4], sizes = [4, 1], strides = [1, 1]} : vector<4x12xf32> to vector<4x1xf32>
    %109 = vector.extract_strided_slice %72 {offsets = [0, 0], sizes = [1, 16], strides = [1, 1]} : vector<4x16xf32> to vector<1x16xf32>
    %110 = vector.broadcast %108 : vector<4x1xf32> to vector<4x16xf32>
    %111 = vector.broadcast %109 : vector<1x16xf32> to vector<4x16xf32>
    %112 = arith.mulf %110, %111 : vector<4x16xf32>
    %113 = arith.addf %107, %112 : vector<4x16xf32>
    %114 = vector.extract_strided_slice %82 {offsets = [0, 5], sizes = [4, 1], strides = [1, 1]} : vector<4x12xf32> to vector<4x1xf32>
    %115 = vector.extract_strided_slice %72 {offsets = [1, 0], sizes = [1, 16], strides = [1, 1]} : vector<4x16xf32> to vector<1x16xf32>
    %116 = vector.broadcast %114 : vector<4x1xf32> to vector<4x16xf32>
    %117 = vector.broadcast %115 : vector<1x16xf32> to vector<4x16xf32>
    %118 = arith.mulf %116, %117 : vector<4x16xf32>
    %119 = arith.addf %113, %118 : vector<4x16xf32>
    %120 = vector.extract_strided_slice %82 {offsets = [0, 6], sizes = [4, 1], strides = [1, 1]} : vector<4x12xf32> to vector<4x1xf32>
    %121 = vector.extract_strided_slice %72 {offsets = [2, 0], sizes = [1, 16], strides = [1, 1]} : vector<4x16xf32> to vector<1x16xf32>
    %122 = vector.broadcast %120 : vector<4x1xf32> to vector<4x16xf32>
    %123 = vector.broadcast %121 : vector<1x16xf32> to vector<4x16xf32>
    %124 = arith.mulf %122, %123 : vector<4x16xf32>
    %125 = arith.addf %119, %124 : vector<4x16xf32>
    %126 = vector.extract_strided_slice %82 {offsets = [0, 7], sizes = [4, 1], strides = [1, 1]} : vector<4x12xf32> to vector<4x1xf32>
    %127 = vector.extract_strided_slice %72 {offsets = [3, 0], sizes = [1, 16], strides = [1, 1]} : vector<4x16xf32> to vector<1x16xf32>
    %128 = vector.broadcast %126 : vector<4x1xf32> to vector<4x16xf32>
    %129 = vector.broadcast %127 : vector<1x16xf32> to vector<4x16xf32>
    %130 = arith.mulf %128, %129 : vector<4x16xf32>
    %131 = arith.addf %125, %130 : vector<4x16xf32>
    %132 = vector.extract_strided_slice %82 {offsets = [0, 8], sizes = [4, 1], strides = [1, 1]} : vector<4x12xf32> to vector<4x1xf32>
    %133 = vector.extract_strided_slice %81 {offsets = [0, 0], sizes = [1, 16], strides = [1, 1]} : vector<4x16xf32> to vector<1x16xf32>
    %134 = vector.broadcast %132 : vector<4x1xf32> to vector<4x16xf32>
    %135 = vector.broadcast %133 : vector<1x16xf32> to vector<4x16xf32>
    %136 = arith.mulf %134, %135 : vector<4x16xf32>
    %137 = arith.addf %131, %136 : vector<4x16xf32>
    %138 = vector.extract_strided_slice %82 {offsets = [0, 9], sizes = [4, 1], strides = [1, 1]} : vector<4x12xf32> to vector<4x1xf32>
    %139 = vector.extract_strided_slice %81 {offsets = [1, 0], sizes = [1, 16], strides = [1, 1]} : vector<4x16xf32> to vector<1x16xf32>
    %140 = vector.broadcast %138 : vector<4x1xf32> to vector<4x16xf32>
    %141 = vector.broadcast %139 : vector<1x16xf32> to vector<4x16xf32>
    %142 = arith.mulf %140, %141 : vector<4x16xf32>
    %143 = arith.addf %137, %142 : vector<4x16xf32>
    %144 = vector.extract_strided_slice %82 {offsets = [0, 10], sizes = [4, 1], strides = [1, 1]} : vector<4x12xf32> to vector<4x1xf32>
    %145 = vector.extract_strided_slice %81 {offsets = [2, 0], sizes = [1, 16], strides = [1, 1]} : vector<4x16xf32> to vector<1x16xf32>
    %146 = vector.broadcast %144 : vector<4x1xf32> to vector<4x16xf32>
    %147 = vector.broadcast %145 : vector<1x16xf32> to vector<4x16xf32>
    %148 = arith.mulf %146, %147 : vector<4x16xf32>
    %149 = arith.addf %143, %148 : vector<4x16xf32>
    %150 = vector.extract_strided_slice %82 {offsets = [0, 11], sizes = [4, 1], strides = [1, 1]} : vector<4x12xf32> to vector<4x1xf32>
    %151 = vector.extract_strided_slice %81 {offsets = [3, 0], sizes = [1, 16], strides = [1, 1]} : vector<4x16xf32> to vector<1x16xf32>
    %152 = vector.broadcast %150 : vector<4x1xf32> to vector<4x16xf32>
    %153 = vector.broadcast %151 : vector<1x16xf32> to vector<4x16xf32>
    %154 = arith.mulf %152, %153 : vector<4x16xf32>
    %155 = arith.addf %149, %154 : vector<4x16xf32>
    %cst_29 = arith.constant dense<0.000000e+00> : vector<4xf32>
    %156 = vector.multi_reduction <add>, %155, %cst_29 [1] : vector<4x16xf32> to vector<4xf32>
    %157 = vector.shape_cast %156 : vector<4xf32> to vector<1x1x1x4xf32>
    %c0_30 = arith.constant 0 : index
    %c0_31 = arith.constant 0 : index
    %c0_32 = arith.constant 0 : index
    %c0_33 = arith.constant 0 : index
    %158 = vector.load %arg9[%c0_30, %c0_31, %c0_32, %c0_33] : memref<1x1x1x4xf32, #tpu.memory_space<vmem>>, vector<1x1x1x4xf32>
    tpu.vector_store %arg9[%c0_30, %c0_31, %c0_32, %c0_33], %157 {strides = array<i32>} : memref<1x1x1x4xf32, #tpu.memory_space<vmem>>, vector<1x1x1x4xf32>,
    %159 = arith.mulf %155, %155 : vector<4x16xf32>
    %cst_34 = arith.constant dense<0.000000e+00> : vector<4xf32>
    %160 = vector.multi_reduction <add>, %159, %cst_34 [1] : vector<4x16xf32> to vector<4xf32>
    %161 = vector.shape_cast %160 : vector<4xf32> to vector<1x1x1x4xf32>
    %c0_35 = arith.constant 0 : index
    %c0_36 = arith.constant 0 : index
    %c0_37 = arith.constant 0 : index
    %c0_38 = arith.constant 0 : index
    %162 = vector.load %arg10[%c0_35, %c0_36, %c0_37, %c0_38] : memref<1x1x1x4xf32, #tpu.memory_space<vmem>>, vector<1x1x1x4xf32>
    tpu.vector_store %arg10[%c0_35, %c0_36, %c0_37, %c0_38], %161 {strides = array<i32>} : memref<1x1x1x4xf32, #tpu.memory_space<vmem>>, vector<1x1x1x4xf32>,
    return
  }
  func.func @transform_0(%arg0: i32, %arg1: i32) -> (i32, i32, i32) {
    %c0_i32 = arith.constant 0 : i32
    %c0_i32_0 = arith.constant 0 : i32
    return %arg0, %c0_i32, %arg1 : i32, i32, i32
  }
  func.func @transform_1(%arg0: i32, %arg1: i32) -> (i32, i32, i32) {
    %c1_i32 = arith.constant 1 : i32
    %0 = arith.muli %arg1, %c1_i32 : i32
    %c1_i32_0 = arith.constant 1 : i32
    %1 = arith.subi %0, %c1_i32_0 : i32
    %c0_i32 = arith.constant 0 : i32
    %2 = arith.maxsi %1, %c0_i32 : i32
    %c0_i32_1 = arith.constant 0 : i32
    %c0_i32_2 = arith.constant 0 : i32
    return %arg0, %c0_i32_1, %2 : i32, i32, i32
  }
  func.func @transform_2(%arg0: i32, %arg1: i32) -> (i32, i32, i32) {
    %c1_i32 = arith.constant 1 : i32
    %0 = arith.addi %arg1, %c1_i32 : i32
    %c1_i32_0 = arith.constant 1 : i32
    %1 = arith.muli %0, %c1_i32_0 : i32
    %c0_i32 = arith.constant 0 : i32
    %2 = arith.minsi %1, %c0_i32 : i32
    %c0_i32_1 = arith.constant 0 : i32
    %c0_i32_2 = arith.constant 0 : i32
    return %arg0, %c0_i32_1, %2 : i32, i32, i32
  }
  func.func @transform_3(%arg0: i32, %arg1: i32) -> (i32, i32) {
    %c0_i32 = arith.constant 0 : i32
    %c0_i32_0 = arith.constant 0 : i32
    %c0_i32_1 = arith.constant 0 : i32
    return %c0_i32, %c0_i32_0 : i32, i32
  }
  func.func @transform_4(%arg0: i32, %arg1: i32) -> (i32, i32) {
    %c0_i32 = arith.constant 0 : i32
    %c0_i32_0 = arith.constant 0 : i32
    %c0_i32_1 = arith.constant 0 : i32
    return %c0_i32, %c0_i32_0 : i32, i32
  }
  func.func @transform_5(%arg0: i32, %arg1: i32) -> (i32, i32) {
    %c0_i32 = arith.constant 0 : i32
    %c0_i32_0 = arith.constant 0 : i32
    %c0_i32_1 = arith.constant 0 : i32
    return %c0_i32, %c0_i32_0 : i32, i32
  }
  func.func @transform_6(%arg0: i32, %arg1: i32) -> (i32, i32) {
    %c0_i32 = arith.constant 0 : i32
    %c0_i32_0 = arith.constant 0 : i32
    %c0_i32_1 = arith.constant 0 : i32
    return %c0_i32, %c0_i32_0 : i32, i32
  }
  func.func @transform_7(%arg0: i32, %arg1: i32) -> (i32, i32, i32, i32) {
    %c0_i32 = arith.constant 0 : i32
    %c0_i32_0 = arith.constant 0 : i32
    %c0_i32_1 = arith.constant 0 : i32
    return %arg0, %arg1, %c0_i32, %c0_i32_0 : i32, i32, i32, i32
  }
  func.func @transform_8(%arg0: i32, %arg1: i32) -> (i32, i32, i32, i32) {
    %c0_i32 = arith.constant 0 : i32
    %c0_i32_0 = arith.constant 0 : i32
    %c0_i32_1 = arith.constant 0 : i32
    return %arg0, %arg1, %c0_i32, %c0_i32_0 : i32, i32, i32, i32
  }
}

</mosaic_0001>

<bundles_post_ra>
// kernel: tpu_custom_call.1
= control target key start
LH: loop header
LB: loop body
LE: loop exit
PB: predicated region body
PF: predicated region fallthrough
CT: control target
= control target key end

     0   :  { %s2214_s0 = inlined_call_operand.hbm [shape: f32[2,4,16], index: 0, kind: input, shape index: {}]   ;;  %s2215_s1 = inlined_call_operand.hbm [shape: f32[2,4,16], index: 1, kind: input, shape index: {}]   ;;  %s2216_s2 = inlined_call_operand.hbm [shape: f32[2,4,16], index: 2, kind: input, shape index: {}]   ;;  %s2217_s3 = inlined_call_operand.vmem [shape: f32[4,3], index: 3, kind: input, shape index: {}]   ;;  %s2218_s4 = inlined_call_operand.hbm [shape: f32[4,5], index: 4, kind: input, shape index: {}]   ;;  %s2219_s5 = inlined_call_operand.vmem [shape: f32[4,7], index: 5, kind: input, shape index: {}]   ;;  %s2220_s6 = inlined_call_operand.hbm [shape: f32[4,12], index: 6, kind: input, shape index: {}]   ;;  %s2221_s7 = inlined_call_operand.hbm [shape: f32[2,1,1,4], index: 7, kind: output, shape index: {0}]   ;;  %s2222_s8 = inlined_call_operand.hbm [shape: f32[2,1,1,4], index: 8, kind: output, shape index: {1}]  }
   0x1   :  { %2236 = sst [smem:[#allocation26_spill]] %s2215_s1 }
   0x2   :  { %2237 = sst [smem:[#allocation27_spill]] %s2218_s4 }
   0x3   :  { %14 = vsyncpa [#allocation4], 0 }
   0x4   :  { %16 = vsyncpa [#allocation4 + $0x1], 0 }
   0x5   :  { %17 = vsyncpa [#allocation7], 0 }
   0x6   :  { %19 = vsyncpa [#allocation7 + $0x1], 0 }
   0x7   :  { %20 = vsyncpa [#allocation10], 0 }
   0x8   :  { %21 = vsyncpa [#allocation5], 0 }
   0x9   :  { %23 = vsyncpa [#allocation5 + $0x1], 0 }
   0xa   :  { %24 = vsyncpa [#allocation14], 0 }
   0xb   :  { %26 = vsyncpa [#allocation14 + $0x1], 0  ;;  %s1792_s27 = smov 0   ;;  %s1794_s28 = smov 0  }
   0xc   :  { %s1796_s29 = smov 0   ;;  %s1798_s30 = smov 0  }
   0xd   :  { %s1800_s9 = smov 0   ;;  %s1802_s10 = smov 0  }
   0xe LB: > { %2238 = sst [smem:[#allocation20_spill]] %s1695_s27  ;;  %s1823_s11 = sadd.s32 4294967295, %s1715_s10   ;;  %s1715_s10 = sphi %s1802_s10, %s32_s10   ;;  %s1711_s9 = sphi %s1800_s9, %s2269_s9   ;;  %s1707_s30 = sphi %s1798_s30, %s2268_s30   ;;  %s1703_s29 = sphi %s1796_s29, %s2272_s29   ;;  %s1699_s28 = sphi %s1794_s28, %s2271_s28   ;;  %s1695_s27 = sphi %s1792_s27, %s2270_s27  }
   0xf   : > { %2239 = sst [smem:[#allocation21_spill]] %s1711_s9  ;;  %s1294_s12 = sadd.s32 4294967294, %s1715_s10  }
  0x10   : > { %2240 = sst [smem:[#allocation22_spill]] %s1715_s10  ;;  %p66_p0 = scmp.ne.s32.totalorder %s1699_s28, %s1695_s27 }
  0x11   : > { %p2230_p1 = scmp.eq.s32.totalorder %s1823_s11, 0  ;;  %p250_p3 = scmp.eq.s32.totalorder %s1294_s12, 1 }
  0x12   : > { %p1295_p5 = scmp.ge.s32.totalorder %s1715_s10, 1  ;;  %p285_p7 = scmp.lt.s32.totalorder %s1715_s10, 3 }
  0x13   : > { %p1832_p4 = por %p2230_p1, %p66_p0  ;;  %p1837_p6 = por %p250_p3, %p66_p0 }
  0x14   : > { %p1842_p8 = pnand %p1295_p5, %p285_p7  ;;  %s1717_s16 = smov [#allocation9]  }
  0x15   : > { %s2241_s13 = scalar_select %p1832_p4, 1, 0 }
  0x16   : > { %s2242_s14 = scalar_select %p1837_p6, 1, 0 }
  0x17   : > { %s2244_s15 = scalar_select %p1842_p8, 1, 0 }
  0x18   : > { %2243 = sst [smem:[#allocation23_spill]] %s2242_s14  ;;  %s301_s17 = sshll.u32 %s1717_s16, 4  ;;  %s302_s17 = int_to_ptr.vmem [resolvable:$true] %s301_s17 }
  0x19   : > { %p1331_p10 = pneg %p1842_p8  ;;  %s44_s19 = sadd.s32 1, %s1711_s9 }
  0x1a   : > { %s53_s20 = sadd.s32 1, %s1703_s29  ;;  %p46_p12 = scmp.ge.s32.totalorder %s44_s19, 2 }
  0x1b   : > { %p1851_p11 = pnand %p1331_p10, %p2230_p1  ;;  %s1472_s21 = scalar_lea.vmem %s302_s17, 64 }
  0x1c   : > { %p1473_p0 = scmp.ne.s32.totalorder %s302_s17, %s1472_s21  ;;  %p1480_p7 = scmp.lt.s32.totalorder %s302_s17, %s302_s17 }
  0x1d   : > { %p2231_p13 = pneg %p1851_p11  ;;  %p1481_p9 = scmp.lt.s32.totalorder %s1472_s21, %s1472_s21 }
  0x1f   : > { %p1475_p3 = pnand %p1473_p0, %p2231_p13  ;;  %p1482_p2 = por %p1481_p9, %p1480_p7 }
  0x21   : > { %p1476_p5 = pneg %p1475_p3 }
  0x23   : > { %p1483_p10 = pnand %p1482_p2, %p1476_p5 }
  0x25   : > { %1486 = shalt.err (!%p1483_p10)
}
  0x26   : > { %s2246_s4 = sld [smem:[#allocation27_spill]]  ;;  %s2274_s19 = smov (%p46_p12, %s44_s19), 0 }
  0x27   : > { %2247 = sst [smem:[#allocation24_spill]] %s2274_s19  ;;  %p60_p2 = scmp.ne.s32.totalorder %s1703_s29, %s1699_s28 }
  0x28   : > { %p61_p9 = scmp.eq.s32.totalorder %s1715_s10, 0  ;;  %s48_s24 = ssub.s32 %s1711_s9, %s2274_s19 }
  0x29   : > { %p1357_p0 = scmp.lt.s32.totalorder %s1715_s10, 2  ;;  %p51_p3 = scmp.eq.s32.totalorder %s48_s24, 0 }
  0x2a   : > { %p62_p5 = por %p61_p9, %p60_p2  ;;  %p2248_p7 = scmp.eq.s32.totalorder %s1823_s11, 1 }
  0x2b   : > { %s2224_s26 = sand.u32 1, %s1703_s29   ;;  %s345_s22 = sand.u32 1, %s1715_s10  }
  0x2c   : > { %1334 = dma.hbm_to_vmem [thread:$0]  (!%p1851_p11), %s2246_s4, 64, %s302_s17, [#allocation10]  }
  0x2d   : > { %p1877_p10 = por %p2248_p7, %p60_p2  ;;  %s1887_s16 = sshll.u32 %s2224_s26, 2 }
  0x2e   : > { %s1883_s12 = scalar_select %p51_p3, %s1703_s29, %s53_s20  }
  0x2f   : > { %s2249_s25 = scalar_select %p1877_p10, 1, 0 }
  0x30   : > { %2250 = sst [smem:[#allocation25_spill]] %s1883_s12  ;;  %s1890_s17 = sshll.u32 %s1711_s9, 6 }
  0x31   : > { %p1892_p12 = pnand %p1357_p0, %p62_p5  ;;  %s2252_s1 = sld [smem:[#allocation26_spill]] }
  0x32   : > { %s349_s20 = scalar_lea.vmem [#allocation6], %s1887_s16  ;;  %s1718_s26 = smov [#allocation11]  }
  0x33   : > { %s360_s19 = sshll.u32 %s349_s20, 4  ;;  %s315_s12 = sshll.u32 %s1718_s26, 4  ;;  %s361_s19 = int_to_ptr.vmem [resolvable:$true] %s360_s19  ;;  %s316_s12 = int_to_ptr.vmem [resolvable:$true] %s315_s12 }
  0x34   : > { %s1902_s14 = scalar_lea.sflag [#allocation7], %s345_s22  ;;  %p2232_p2 = pneg %p1892_p12 }
  0x35   : > { %s1500_s9 = scalar_lea.vmem %s361_s19, 64  ;;  %s1719_s10 = smov [#allocation6]  }
  0x36   : > { %p1501_p9 = scmp.ne.s32.totalorder %s361_s19, %s1500_s9  ;;  %s1505_s27 = sshll.u32 %s1719_s10, 4  ;;  %s1506_s27 = int_to_ptr.vmem [resolvable:$false] %s1505_s27 }
  0x37   : > { %s358_s4 = scalar_lea.hbm %s2252_s1, %s1890_s17  ;;  %s1507_s23 = scalar_lea.vmem %s1506_s27, 128 }
  0x38   : > { %p1503_p0 = pnand %p1501_p9, %p2232_p2  ;;  %p1508_p5 = scmp.lt.s32.totalorder %s361_s19, %s1506_s27 }
  0x39   : > { %p1509_p7 = scmp.lt.s32.totalorder %s1507_s23, %s1500_s9 }
  0x3a   : > { %p1504_p3 = pneg %p1503_p0 }
  0x3b   : > { %p1510_p1 = por %p1509_p7, %p1508_p5 }
  0x3d   : > { %p1511_p13 = pnand %p1510_p1, %p1504_p3 }
  0x3f   : > { %1514 = shalt.err (!%p1511_p13)
}
  0x40   : > { %1344 = dma.hbm_to_vmem [thread:$0]  (!%p1892_p12), %s358_s4, 64, %s361_s19, %s1902_s14  }
  0x41   : > { %s1526_s26 = scalar_lea.vmem %s316_s12, 64  ;;  %p2253_p9 = pneg %p1851_p11 }
  0x42   : > { %p1527_p6 = scmp.ne.s32.totalorder %s316_s12, %s1526_s26  ;;  %p1534_p10 = scmp.lt.s32.totalorder %s316_s12, %s316_s12 }
  0x43   : > { %p1535_p4 = scmp.lt.s32.totalorder %s1526_s26, %s1526_s26 }
  0x44   : > { %p1529_p0 = pnand %p1527_p6, %p2253_p9 }
  0x45   : > { %p1536_p8 = por %p1535_p4, %p1534_p10 }
  0x46   : > { %p1530_p2 = pneg %p1529_p0 }
  0x48   : > { %p1537_p5 = pnand %p1536_p8, %p1530_p2 }
  0x4a   : > { %1540 = shalt.err (!%p1537_p5)
}
  0x4b   : > { %1337 = dma.hbm_to_vmem [thread:$0]  (!%p1851_p11), %s2220_s6, 64, %s316_s12, [#allocation10]  }
  0x4c   : > { %s336_s19 = scalar_lea.hbm %s2214_s0, %s1890_s17  ;;  %s330_s22 = scalar_lea.vmem [#allocation3], %s1887_s16 }
  0x4d   : > { %s338_s24 = sshll.u32 %s330_s22, 4  ;;  %s380_s18 = scalar_lea.hbm %s2216_s2, %s1890_s17  ;;  %s339_s24 = int_to_ptr.vmem [resolvable:$true] %s338_s24 }
  0x4e   : > { %s2254_s26 = sand.u32 1, %s1703_s29   ;;  %s1554_s27 = scalar_lea.vmem %s339_s24, 64 }
  0x4f   : > { %s327_s1 = scalar_lea.sflag [#allocation4], %s2254_s26  ;;  %p1555_p1 = scmp.ne.s32.totalorder %s339_s24, %s1554_s27 }
  0x50   : > { %p2255_p4 = pneg %p1892_p12  ;;  %s1720_s12 = smov [#allocation3]  }
  0x51   : > { %s1559_s9 = sshll.u32 %s1720_s12, 4  ;;  %s1560_s9 = int_to_ptr.vmem [resolvable:$false] %s1559_s9 }
  0x52   : > { %p1557_p6 = pnand %p1555_p1, %p2255_p4  ;;  %s1561_s4 = scalar_lea.vmem %s1560_s9, 128 }
  0x53   : > { %p1562_p11 = scmp.lt.s32.totalorder %s339_s24, %s1560_s9  ;;  %p1563_p13 = scmp.lt.s32.totalorder %s1561_s4, %s1554_s27 }
  0x54   : > { %p1558_p8 = pneg %p1557_p6 }
  0x55   : > { %p1564_p10 = por %p1563_p13, %p1562_p11 }
  0x57   : > { %p1565_p2 = pnand %p1564_p10, %p1558_p8 }
  0x59   : > { %1568 = shalt.err (!%p1565_p2)
}
  0x5a   : > { %1341 = dma.hbm_to_vmem [thread:$0]  (!%p1892_p12), %s336_s19, 64, %s339_s24, %s327_s1  }
  0x5b   : > { %s371_s10 = scalar_lea.vmem [#allocation8], %s1887_s16  ;;  %p2256_p7 = pmov %p2255_p4 }
  0x5c   : > { %s382_s22 = sshll.u32 %s371_s10, 4  ;;  %s1721_s23 = smov [#allocation8]   ;;  %s383_s22 = int_to_ptr.vmem [resolvable:$true] %s382_s22 }
  0x5d   : > { %s1582_s20 = scalar_lea.vmem %s383_s22, 64  ;;  %s1587_s26 = sshll.u32 %s1721_s23, 4  ;;  %s1588_s26 = int_to_ptr.vmem [resolvable:$false] %s1587_s26 }
  0x5e   : > { %p1583_p3 = scmp.ne.s32.totalorder %s383_s22, %s1582_s20  ;;  %s1589_s27 = scalar_lea.vmem %s1588_s26, 128 }
  0x5f   : > { %p1590_p5 = scmp.lt.s32.totalorder %s383_s22, %s1588_s26  ;;  %p1591_p1 = scmp.lt.s32.totalorder %s1589_s27, %s1582_s20 }
  0x60   : > { %p1585_p9 = pnand %p1583_p3, %p2256_p7 }
  0x61   : > { %p1592_p4 = por %p1591_p1, %p1590_p5 }
  0x62   : > { %p1586_p0 = pneg %p1585_p9 }
  0x64   : > { %p1593_p6 = pnand %p1592_p4, %p1586_p0 }
  0x66   : > { %1596 = shalt.err (!%p1593_p6)
}
  0x67   : > { %1347 = dma.hbm_to_vmem [thread:$0]  (!%p1892_p12), %s380_s18, 64, %s383_s22, %s1902_s14  }
  0x68   : > { %p2257_p8 = scmp.ne.s32.totalorder %s2244_s15, 0 }
  0x69   : > { %s1951_s19 = sand.u32 (!%p2257_p8), 1, %s1699_s28   ;;  %p2258_p11 = scmp.ne.s32.totalorder (!%p2257_p8), %s2241_s13, 0 }
  0x6a   : > { %391 = sbr.rel (%p2257_p8) target bundleno = 828 (0x33c), region = 48  ;;  %s1306_s24 = sshll.u32 (!%p2257_p8), %s1951_s19, 2 }
  0x6b   : > { %s394_s12 = scalar_lea.sflag (!%p2257_p8), [#allocation4], %s1951_s19  ;;  %s397_s9 = scalar_lea.vmem (!%p2257_p8), [#allocation3], %s1306_s24 }
  0x6f   : > { %1674 = dma.done.wait (%p2258_p11), %s394_s12, 64  }
  0x70   : > { %1676 = vsyncadd (%p2258_p11), %s394_s12, 4294967232  ;;  %s402_s14 = sand.u32 1, %s1823_s11  }
  0x71   : > { %s403_s17 = scalar_lea.sflag [#allocation7], %s402_s14 }
  0x72   : > { %1678 = dma.done.wait (%p2258_p11), %s403_s17, 128  }
  0x73   : > { %1680 = vsyncadd (%p2258_p11), %s403_s17, 4294967168  ;;  %p2259_p12 = scmp.eq.s32.totalorder %s1823_s11, 0 }
  0x75   : > { %1682 = dma.done.wait (%p2259_p12), [#allocation10], 128   ;;  %p2260_p13 = pmov %p2259_p12 }
  0x76   : > { %v1722_v0 = vmov 1   ;;  %vm478_vm0 = vcmask 1044432   ;;  %v1723_v1 = vmov 0.0   ;;  %vm476_vm1 = vcmask 125952   ;;  %v484_v2 = vld [vmem:[%s2219_s5] sm:$0xf] }
  0x77   : > { %1684 = vsyncadd (%p2260_p13), [#allocation10], 4294967168  ;;  %1436 = vset.pattern.permute.xlu1 %v1722_v0  ;;  %1434 = vset.pattern.permute.xlu0 %v1722_v0  ;;  %479 = vst.msk [vmem:[#allocation2] sm:$0xf] %vm478_vm0, %v1723_v1  ;;  %v483_v3 = vld [vmem:[#allocation9] sm:$0xf]  ;;  %v666_v54 = vlaneseq }
  0x78   : > { %vm480_vm2 = vcmask 175232   ;;  %501 = vperm.xlu1 %1436, %v484_v2   ;;  %514 = vperm.xlu0 %1434, %v483_v3   ;;  %v475_v4 = vld [vmem:[%s397_s9] sm:$0xf]  ;;  %v1724_v5 = vmov 3   ;;  %v1725_v6 = vmov 2   ;;  %v1726_v7 = vmov 4  }
  0x79   : > { %477 = vst.msk [vmem:[#allocation2 + $0x4] sm:$0xf] %vm476_vm1, %v475_v4  ;;  %v1727_v8 = vmov 5   ;;  %v1981_v9 = vld [vmem:[%s2217_s3] sm:$0xf]  ;;  %v1728_v11 = vmov 6  }
  0x7a   : > { %481 = vst.msk [vmem:[#allocation2 + $0x4] sm:$0xf] %vm480_vm2, %v1723_v1  ;;  %v1985_v10 = vld [vmem:[#allocation11] sm:$0xf]  ;;  %v1729_v12 = vmov 7   ;;  %v1730_v13 = vmov 0  }
  0x7b   : > { %v1731_v14 = vmov 8   ;;  %s1732_s18 = smov 126   ;;  %s1733_s4 = smov 124   ;;  %v1738_v37 = vmov 9   ;;  %v1739_v38 = vmov 10   ;;  %v1740_v40 = vmov 11  }
  0x7c   : > { %1437 = vset.pattern.permute.xlu1 %v1724_v5  ;;  %1435 = vset.pattern.permute.xlu0 %v1725_v6  ;;  %s1734_s10 = smov 122   ;;  %s1735_s22 = smov 120   ;;  %vm509_vm3 = vcmask 1031168   ;;  %vm534_vm4 = vcmask 1014784   ;;  %vm580_vm5 = vcmask 998400   ;;  %v2026_v61 = vshrl.u32 %v666_v54, 7 }
  0x7d   : > { %597 = vperm.xlu1 %1437, %v483_v3   ;;  %560 = vperm.xlu0 %1435, %v483_v3   ;;  %s1736_s20 = smov 118   ;;  %s1737_s23 = smov 116   ;;  %vm617_vm6 = vcmask 982016   ;;  %vm642_vm7 = vcmask 965632   ;;  %vm655_vm8 = vcmask 949248   ;;  %vm555_vm9 = vcmask 1039360  }
  0x7e   : > { %s1741_s26 = smov 127   ;;  %v2030_v4 = vsub.s32 1, %v2026_v61  ;;  %s1742_s27 = smov 3   ;;  %vm797_vm10 = vcmask 23552   ;;  %vm939_vm11 = vcmask 39936   ;;  %vm1056_vm12 = vcmask 7168  }
  0x7f   : > { %s1743_s1 = smov 5   ;;  %s1744_s16 = smov 1   ;;  %vm1070_vm13 = vcmask 24576  }
  0x80   : > { %s1309_s24 = sshll.u32 %s1707_s30, 4  ;;  %s462_s12 = scalar_lea.vmem [#allocation12], %s1951_s19 }
  0x81   : > { %1438 = vset.pattern.permute.xlu1 %v1725_v6  ;;  %1439 = vset.pattern.permute.xlu0 %v1726_v7  ;;  %v1993_v15 = vld [vmem:[#allocation2] sm:$0xff]  ;;  %s1110_s9 = sshll.u32 %s462_s12, 4  ;;  %s2138_s15 = scalar_lea.hbm %s2221_s7, %s1309_s24  ;;  %s2140_s9 = int_to_ptr.vmem [resolvable:$true] %s1110_s9 }
  0x82   : > { %526 = vperm.xlu1 %1438, %v484_v2   ;;  %622 = vperm.xlu0 %1439, %v483_v3   ;;  %v545_v19 = vld [vmem:[#allocation2 + $0x4] sm:$0xf]  ;;  %s468_s21 = scalar_lea.vmem [#allocation13], %s1951_s19  ;;  %s1093_s13 = scalar_lea.sflag [#allocation5], %s1951_s19 }
  0x83   : > { %s2145_s11 = sshll.u32 %s468_s21, 4  ;;  %p2261_p2 = scmp.ne.s32.totalorder %s2249_s25, 0  ;;  %s1125_s11 = int_to_ptr.vmem [resolvable:$true] %s2145_s11 }
  0x86   : > { %1440 = vset.pattern.permute.xlu1 %v1724_v5  ;;  %1442 = vset.pattern.permute.xlu0 %v1727_v8 }
  0x87   : > { %572 = vperm.xlu1 %1440, %v484_v2   ;;  %634 = vperm.xlu0 %1442, %v484_v2  }
  0x8b   : > { %1441 = vset.pattern.permute.xlu1 %v1726_v7  ;;  %1445 = vset.pattern.permute.xlu0 %v1725_v6 }
  0x8c   : > { %609 = vperm.xlu1 %1441, %v484_v2   ;;  %585 = vperm.xlu0 %1445, %v1981_v9  }
  0x90   : > { %1443 = vset.pattern.permute.xlu1 %v1728_v11  ;;  %1447 = vset.pattern.permute.xlu0 %v1726_v7 }
  0x91   : > { %647 = vperm.xlu1 %1443, %v484_v2   ;;  %767 = vperm.xlu0 %1447, %v1985_v10  }
  0x95   : > { %1444 = vset.pattern.permute.xlu1 %v1722_v0  ;;  %1450 = vset.pattern.permute.xlu0 %v1729_v12 }
  0x96   : > { %547 = vperm.xlu1 %1444, %v1981_v9  }
  0x9a   : > { %1446 = vset.pattern.permute.xlu1 %v1730_v13 }
  0x9b   : > { %495 = vperm.xlu1 %1446, %v483_v3  }
  0x9f   : > { %488 = vperm.xlu1 %1446, %v484_v2  }
  0xa3   : > { %1448 = vset.pattern.permute.xlu1 %v1727_v8  ;;  %v2033_v8 = vsub.s32 0, %v2026_v61 }
  0xa4   : > { %804 = vperm.xlu1 %1448, %v1985_v10  }
  0xa8   : > { %1449 = vset.pattern.permute.xlu1 %v1728_v11  ;;  %v2040_v11 = vsub.s32 4, %v2026_v61 }
  0xa9   : > { %839 = vperm.xlu1 %1449, %v1985_v10  }
  0xad   : > { %1451 = vset.pattern.permute.xlu1 %v1731_v14 }
  0xf3   : > { %v502_v16 = vpop.permute.xlu1 %501  ;;  %v515_v17 = vpop.permute.xlu0 %514 }
  0xf4   : > { %v517_v18 = vmul.f32 %v515_v17, %v1993_v15  ;;  %v504_v20 = vmul.f32 %v502_v16, %v1993_v15  ;;  %v2045_v17 = vsub.s32 5, %v2026_v61 }
  0xf6   : > { %519 = vrot.lane.b32.xlu0 %v517_v18, %s1732_s18 }
  0xf8   : > { %v598_v21 = vpop.permute.xlu1 %597  ;;  %v561_v22 = vpop.permute.xlu0 %560 }
  0xf9   : > { %v563_v23 = vmul.f32 %v561_v22, %v545_v19  ;;  %v600_v24 = vmul.f32 %v598_v21, %v545_v19 }
  0xfa   : > { %506 = vrot.lane.b32.xlu0 %v504_v20, %s1732_s18 }
  0xfb   : > { %565 = vrot.lane.b32.xlu1 %v563_v23, %s1733_s4 }
  0xfd   : > { %v527_v25 = vpop.permute.xlu1 %526  ;;  %v623_v26 = vpop.permute.xlu0 %622 }
  0xfe   : > { %v529_v27 = vmul.f32 %v527_v25, %v1993_v15  ;;  %v625_v28 = vmul.f32 %v623_v26, %v545_v19 }
  0xff   : > { %602 = vrot.lane.b32.xlu1 %v600_v24, %s1734_s10 }
 0x100   : > { %531 = vrot.lane.b32.xlu0 %v529_v27, %s1733_s4  ;;  %s1745_s4 = smov [#allocation12]  }
 0x102   : > { %v573_v29 = vpop.permute.xlu1 %572  ;;  %v635_v32 = vpop.permute.xlu0 %634 }
 0x103   : > { %v575_v30 = vmul.f32 %v573_v29, %v545_v19  ;;  %627 = vrot.lane.b32.xlu1 %v625_v28, %s1735_s22  ;;  %v637_v34 = vmul.f32 %v635_v32, %v545_v19 }
 0x105   : > { %577 = vrot.lane.b32.xlu0 %v575_v30, %s1734_s10  ;;  %s1601_s10 = sshll.u32 %s1745_s4, 4  ;;  %s1602_s10 = int_to_ptr.vmem [resolvable:$false] %s1601_s10 }
 0x106   : > { %p1604_p9 = scmp.lt.s32.totalorder %s2140_s9, %s1602_s10 }
 0x107   : > { %v610_v31 = vpop.permute.xlu1 %609  ;;  %v586_v42 = vpop.permute.xlu0 %585 }
 0x108   : > { %v612_v33 = vmul.f32 %v610_v31, %v545_v19  ;;  %v588_v43 = vmul.f32 %v586_v42, %v545_v19  ;;  %v2057_v31 = vsub.s32 6, %v2026_v61 }
 0x10a   : > { %614 = vrot.lane.b32.xlu1 %v612_v33, %s1735_s22  ;;  %s1603_s22 = scalar_lea.vmem %s1602_s10, 32 }
 0x10c   : > { %v648_v35 = vpop.permute.xlu1 %647  ;;  %v2018_v47 = vpop.permute.xlu0 %767 }
 0x10d   : > { %v650_v36 = vmul.f32 %v648_v35, %v545_v19 }
 0x10e   : > { %639 = vrot.lane.b32.xlu1 %v637_v34, %s1736_s20 }
 0x10f   : > { %652 = vrot.lane.b32.xlu0 %v650_v36, %s1737_s23 }
 0x111   : > { %v548_v39 = vpop.permute.xlu1 %547 }
 0x112   : > { %909 = vperm.xlu1 %1451, %v1985_v10   ;;  %v550_v41 = vmul.f32 %v548_v39, %v545_v19 }
 0x113   : > { %874 = vperm.xlu0 %1450, %v1985_v10  }
 0x116   : > { %1452 = vset.pattern.permute.xlu1 %v1738_v37  ;;  %v496_v44 = vpop.permute.xlu1 %495 }
 0x117   : > { %946 = vperm.xlu1 %1452, %v1985_v10   ;;  %1453 = vset.pattern.permute.xlu0 %v1739_v38  ;;  %v498_v56 = vmul.f32 %v496_v44, %v1993_v15 }
 0x118   : > { %981 = vperm.xlu0 %1453, %v1985_v10  }
 0x11a   : > { %v489_v45 = vpop.permute.xlu1 %488 }
 0x11b   : > { %1454 = vset.pattern.permute.xlu1 %v1740_v40  ;;  %v491_v14 = vmul.f32 %v489_v45, %v1993_v15 }
 0x11c   : > { %1016 = vperm.xlu1 %1454, %v1985_v10   ;;  %1456 = vset.pattern.permute.xlu0 %v1730_v13 }
 0x11d   : > { %662 = vperm.xlu0 %1456, %v1985_v10  }
 0x11f   : > { %v2016_v46 = vpop.permute.xlu1 %804 }
 0x120   : > { %1455 = vset.pattern.permute.xlu1 %v1730_v13 }
 0x121   : > { %540 = vperm.xlu1 %1455, %v1981_v9   ;;  %552 = vrot.lane.b32.xlu0 %v550_v41, %s1741_s26  ;;  %v2036_v9 = vsub.s32 2, %v2026_v61 }
 0x122   : > { %1459 = vset.pattern.permute.xlu0 %v1724_v5 }
 0x124   : > { %v2020_v48 = vpop.permute.xlu1 %839 }
 0x125   : > { %1457 = vset.pattern.permute.xlu1 %v1722_v0  ;;  %741 = vperm.xlu0 %1459, %v1985_v10  }
 0x126   : > { %689 = vperm.xlu1 %1457, %v1985_v10  }
 0x129   : > { %1460 = vset.pattern.permute.xlu0 %v1740_v40 }
 0x12a   : > { %1458 = vset.pattern.permute.xlu1 %v1725_v6 }
 0x12b   : > { %715 = vperm.xlu1 %1458, %v1985_v10  }
 0x12f   : > { %590 = vrot.lane.b32.xlu1 %v588_v43, %s1732_s18  ;;  %s1597_s18 = scalar_lea.vmem %s2140_s9, 16 }
 0x130   : > { %p1598_p10 = scmp.ne.s32.totalorder %s2140_s9, %s1597_s18  ;;  %p1605_p0 = scmp.lt.s32.totalorder %s1603_s22, %s1597_s18 }
 0x132   : > { %p1599_p3 = pnand %p1598_p10, %p2261_p2  ;;  %p1606_p5 = por %p1605_p0, %p1604_p9 }
 0x134   : > { %p1600_p7 = pneg %p1599_p3 }
 0x136   : > { %p1607_p1 = pnand %p1606_p5, %p1600_p7 }
 0x168   : > { %v520_v49 = vpop.permute.xlu0 %519 }
 0x169   : > { %v521_v50 = vrot.slane %v520_v49, 4 }
 0x16b   : > { %v522_v55 = vsel %vm509_vm3, %v520_v49, %v521_v50 }
 0x16c   : > { %v507_v52 = vpop.permute.xlu0 %506  ;;  %v524_v62 = vadd.f32 %v522_v55, %v498_v56 }
 0x16d   : > { %v566_v51 = vpop.permute.xlu1 %565  ;;  %v508_v0 = vrot.slane %v507_v52, 4 }
 0x16e   : > { %v567_v53 = vrot.slane %v566_v51, 4 }
 0x16f   : > { %v510_v12 = vsel %vm509_vm3, %v507_v52, %v508_v0  ;;  %v2073_v52 = vsub.s32 3, %v2026_v61 }
 0x170   : > { %v568_v58 = vsel %vm534_vm4, %v567_v53, %v566_v51  ;;  %v512_v22 = vadd.f32 %v510_v12, %v491_v14  ;;  %v2076_v53 = vsub.s32 7, %v2026_v61 }
 0x171   : > { %v603_v57 = vpop.permute.xlu1 %602  ;;  %v570_v1 = vadd.f32 %v568_v58, %v524_v62 }
 0x172   : > { %v604_v59 = vrot.slane %v603_v57, 4  ;;  %v532_v60 = vpop.permute.xlu0 %531 }
 0x173   : > { %v533_v6 = vrot.slane %v532_v60, 4 }
 0x174   : > { %v605_v63 = vsel %vm580_vm5, %v604_v59, %v603_v57 }
 0x175   : > { %v628_v2 = vpop.permute.xlu1 %627  ;;  %v607_v5 = vadd.f32 %v605_v63, %v570_v1  ;;  %v535_v18 = vsel %vm534_vm4, %v532_v60, %v533_v6 }
 0x176   : > { %v629_v3 = vrot.slane %v628_v2, 4  ;;  %v537_v28 = vadd.f32 %v535_v18, %v512_v22 }
 0x177   : > { %v578_v7 = vpop.permute.xlu0 %577 }
 0x178   : > { %v630_v10 = vsel %vm617_vm6, %v629_v3, %v628_v2  ;;  %v579_v16 = vrot.slane %v578_v7, 4 }
 0x179   : > { %v632_v13 = vadd.f32 %v630_v10, %v607_v5 }
 0x17a   : > { %v581_v29 = vsel %vm580_vm5, %v579_v16, %v578_v7 }
 0x17b   : > { %v810_v19 = vrot.slane %v632_v13, %v2030_v4  ;;  %v774_v20 = vrot.slane %v632_v13, %v2033_v8  ;;  %v845_v21 = vrot.slane %v632_v13, %v2036_v9  ;;  %v778_v24 = vrot.slane %v632_v13, %v2040_v11 }
 0x17c   : > { %v615_v23 = vpop.permute.xlu1 %614  ;;  %v814_v30 = vrot.slane %v632_v13, %v2045_v17  ;;  %v583_v38 = vadd.f32 %v581_v29, %v537_v28  ;;  %v849_v43 = vrot.slane %v632_v13, %v2057_v31  ;;  %v884_v59 = vrot.slane %v632_v13, %v2076_v53 }
 0x17d   : > { %v616_v25 = vrot.slane %v615_v23, 4  ;;  %v820_v26 = vrot.slane %v810_v19, %v2030_v4  ;;  %v784_v27 = vrot.slane %v774_v20, %v2033_v8  ;;  %v855_v34 = vrot.slane %v845_v21, %v2036_v9 }
 0x17e   : > { %v788_v35 = vrot.slane %v778_v24, %v2033_v8  ;;  %v824_v42 = vrot.slane %v814_v30, %v2030_v4  ;;  %v859_v57 = vrot.slane %v849_v43, %v2036_v9  ;;  %v894_v1 = vrot.slane %v884_v59, %v2073_v52 }
 0x17f   : > { %v825_v32 = vmul.f32 %v820_v26, %v2016_v46  ;;  %v789_v33 = vmul.f32 %v784_v27, %v2018_v47  ;;  %v618_v36 = vsel %vm617_vm6, %v616_v25, %v615_v23  ;;  %v860_v49 = vmul.f32 %v855_v34, %v2020_v48 }
 0x180   : > { %v640_v37 = vpop.permute.xlu1 %639  ;;  %v620_v44 = vadd.f32 %v618_v36, %v583_v38  ;;  %v790_v50 = vmul.f32 %v788_v35, %v2018_v47  ;;  %v826_v56 = vmul.f32 %v824_v42, %v2016_v46  ;;  %v880_v47 = vrot.slane %v632_v13, %v2073_v52 }
 0x181   : > { %v641_v39 = vrot.slane %v640_v37, 4  ;;  %v653_v40 = vpop.permute.xlu0 %652  ;;  %829 = vrot.lane.b32.xlu0 %v825_v32, %s1742_s27  ;;  %793 = vrot.lane.b32.xlu1 %v789_v33, %s1742_s27  ;;  %v861_v60 = vmul.f32 %v859_v57, %v2020_v48 }
 0x182   : > { %v654_v41 = vrot.slane %v653_v40, 4  ;;  %v890_v46 = vrot.slane %v880_v47, %v2073_v52 }
 0x183   : > { %v643_v45 = vsel %vm642_vm7, %v641_v39, %v640_v37 }
 0x184   : > { %v645_v51 = vadd.f32 %v643_v45, %v620_v44  ;;  %v656_v55 = vsel %vm655_vm8, %v654_v41, %v653_v40 }
 0x185   : > { %864 = vrot.lane.b32.xlu0 %v860_v49, %s1742_s27  ;;  %795 = vrot.lane.b32.xlu1 %v790_v50, %s1742_s27 }
 0x186   : > { %v658_v58 = vadd.f32 %v656_v55, %v645_v51 }
 0x188   : > { %v916_v63 = vrot.slane %v658_v58, %v2033_v8  ;;  %v920_v0 = vrot.slane %v658_v58, %v2040_v11  ;;  %v952_v6 = vrot.slane %v658_v58, %v2030_v4  ;;  %v956_v10 = vrot.slane %v658_v58, %v2045_v17 }
 0x189   : > { %831 = vrot.lane.b32.xlu1 %v826_v56, %s1742_s27  ;;  %v987_v16 = vrot.slane %v658_v58, %v2036_v9  ;;  %v991_v20 = vrot.slane %v658_v58, %v2057_v31  ;;  %v1022_v25 = vrot.slane %v658_v58, %v2073_v52  ;;  %v1026_v28 = vrot.slane %v658_v58, %v2076_v53 }
 0x18a   : > { %v926_v7 = vrot.slane %v916_v63, %v2033_v8  ;;  %v930_v48 = vrot.slane %v920_v0, %v2033_v8  ;;  %v962_v18 = vrot.slane %v952_v6, %v2030_v4  ;;  %v966_v19 = vrot.slane %v956_v10, %v2030_v4 }
 0x18b   : > { %v997_v26 = vrot.slane %v987_v16, %v2036_v9  ;;  %v1001_v27 = vrot.slane %v991_v20, %v2036_v9  ;;  %v1032_v34 = vrot.slane %v1022_v25, %v2073_v52  ;;  %v1036_v35 = vrot.slane %v1026_v28, %v2073_v52 }
 0x18d   : > { %v910_v62 = vpop.permute.xlu1 %909  ;;  %866 = vrot.lane.b32.xlu1 %v861_v60, %s1742_s27 }
 0x18e   : > { %v875_v2 = vpop.permute.xlu0 %874  ;;  %v931_v13 = vmul.f32 %v926_v7, %v910_v62  ;;  %v932_v14 = vmul.f32 %v930_v48, %v910_v62 }
 0x18f   : > { %v895_v3 = vmul.f32 %v890_v46, %v875_v2  ;;  %v896_v5 = vmul.f32 %v894_v1, %v875_v2 }
 0x191   : > { %899 = vrot.lane.b32.xlu0 %v895_v3, %s1742_s27  ;;  %901 = vrot.lane.b32.xlu1 %v896_v5, %s1742_s27 }
 0x192   : > { %v947_v12 = vpop.permute.xlu1 %946 }
 0x193   : > { %v982_v21 = vpop.permute.xlu0 %981  ;;  %v967_v22 = vmul.f32 %v962_v18, %v947_v12  ;;  %v968_v23 = vmul.f32 %v966_v19, %v947_v12 }
 0x194   : > { %v1002_v30 = vmul.f32 %v997_v26, %v982_v21  ;;  %v1003_v32 = vmul.f32 %v1001_v27, %v982_v21 }
 0x195   : > { %937 = vrot.lane.b32.xlu1 %v932_v14, %s1743_s1  ;;  %935 = vrot.lane.b32.xlu0 %v931_v13, %s1743_s1 }
 0x197   : > { %v1017_v24 = vpop.permute.xlu1 %1016 }
 0x198   : > { %v663_v29 = vpop.permute.xlu0 %662  ;;  %v1037_v36 = vmul.f32 %v1032_v34, %v1017_v24  ;;  %v1038_v37 = vmul.f32 %v1036_v35, %v1017_v24 }
 0x199   : > { %973 = vrot.lane.b32.xlu1 %v968_v23, %s1743_s1  ;;  %971 = vrot.lane.b32.xlu0 %v967_v22, %s1743_s1 }
 0x19c   : > { %v541_v33 = vpop.permute.xlu1 %540  ;;  %v553_v38 = vpop.permute.xlu0 %552 }
 0x19d   : > { %1008 = vrot.lane.b32.xlu1 %v1003_v32, %s1743_s1  ;;  %1006 = vrot.lane.b32.xlu0 %v1002_v30, %s1743_s1  ;;  %v554_v40 = vrot.slane %v553_v38, 4  ;;  %v543_v41 = vmul.f32 %v541_v33, %v1993_v15 }
 0x19f   : > { %v556_v43 = vsel %vm555_vm9, %v554_v40, %v553_v38 }
 0x1a0   : > { %v558_v44 = vadd.f32 %v556_v43, %v543_v41  ;;  %v742_v0 = vpop.permute.xlu0 %741 }
 0x1a1   : > { %1043 = vrot.lane.b32.xlu1 %v1038_v37, %s1743_s1  ;;  %1041 = vrot.lane.b32.xlu0 %v1037_v36, %s1743_s1  ;;  %v690_v39 = vpop.permute.xlu1 %689 }
 0x1a6   : > { %v716_v42 = vpop.permute.xlu1 %715 }
 0x1aa   : > { %v591_v45 = vpop.permute.xlu1 %590 }
 0x1ab   : > { %v592_v49 = vrot.slane %v591_v45, 4 }
 0x1ad   : > { %v593_v50 = vsel %vm509_vm3, %v592_v49, %v591_v45 }
 0x1ae   : > { %v595_v51 = vadd.f32 %v593_v50, %v558_v44 }
 0x1b0   : > { %v673_v55 = vrot.slane %v595_v51, %v2040_v11  ;;  %v699_v56 = vrot.slane %v595_v51, %v2045_v17  ;;  %v725_v57 = vrot.slane %v595_v51, %v2057_v31  ;;  %v747_v58 = vrot.slane %v595_v51, %v2073_v52 }
 0x1b1   : > { %v751_v47 = vrot.slane %v595_v51, %v2076_v53  ;;  %v669_v15 = vrot.slane %v595_v51, %v2033_v8  ;;  %v695_v59 = vrot.slane %v595_v51, %v2030_v4  ;;  %v721_v60 = vrot.slane %v595_v51, %v2036_v9 }
 0x1b2   : > { %v683_v62 = vrot.slane %v673_v55, %v2033_v8  ;;  %v709_v63 = vrot.slane %v699_v56, %v2030_v4  ;;  %v735_v11 = vrot.slane %v725_v57, %v2036_v9  ;;  %v757_v17 = vrot.slane %v747_v58, %v2073_v52 }
 0x1b3   : > { %v761_v31 = vrot.slane %v751_v47, %v2073_v52  ;;  %v679_v46 = vrot.slane %v669_v15, %v2033_v8  ;;  %v705_v53 = vrot.slane %v695_v59, %v2030_v4  ;;  %v731_v1 = vrot.slane %v721_v60, %v2036_v9 }
 0x1b4   : > { %v685_v2 = vmul.f32 %v683_v62, %v663_v29  ;;  %v711_v3 = vmul.f32 %v709_v63, %v690_v39  ;;  %v737_v5 = vmul.f32 %v735_v11, %v716_v42  ;;  %v762_v13 = vmul.f32 %v757_v17, %v742_v0 }
 0x1b5   : > { %v684_v6 = vmul.f32 %v679_v46, %v663_v29  ;;  %v710_v7 = vmul.f32 %v705_v53, %v690_v39  ;;  %v736_v48 = vmul.f32 %v731_v1, %v716_v42  ;;  %v763_v12 = vmul.f32 %v761_v31, %v742_v0 }
 0x1b6   : > { %v713_v10 = vadd.f32 %v711_v3, %v685_v2 }
 0x1b7   : > { %v712_v14 = vadd.f32 %v710_v7, %v684_v6 }
 0x1b8   : > { %v739_v16 = vadd.f32 %v737_v5, %v713_v10  ;;  %v1064_v5 = vand.u32 127, %v666_v54 }
 0x1b9   : > { %v738_v18 = vadd.f32 %v736_v48, %v712_v14 }
 0x1ba   : > { %v765_v52 = vadd.f32 %v763_v12, %v739_v16  ;;  %v1067_v6 = vsub.s32 %v1064_v5, %v2026_v61 }
 0x1bb   : > { %v764_v19 = vadd.f32 %v762_v13, %v738_v18 }
 0x1f3   : > { %v794_v20 = vpop.permute.xlu1 %793  ;;  %v830_v21 = vpop.permute.xlu0 %829 }
 0x1f4   : > { %v801_v23 = vadd.f32 %v794_v20, %v764_v19 }
 0x1f6   : > { %v836_v27 = vadd.f32 %v830_v21, %v801_v23 }
 0x1f7   : > { %v796_v8 = vpop.permute.xlu1 %795  ;;  %v865_v22 = vpop.permute.xlu0 %864 }
 0x1f8   : > { %v798_v26 = vsel %vm797_vm10, %v794_v20, %v796_v8  ;;  %v871_v35 = vadd.f32 %v865_v22, %v836_v27 }
 0x1f9   : > { %v802_v29 = vadd.f32 %v798_v26, %v765_v52 }
 0x1fb   : > { %v832_v4 = vpop.permute.xlu1 %831 }
 0x1fc   : > { %v833_v28 = vsel %vm797_vm10, %v830_v21, %v832_v4 }
 0x1fd   : > { %v837_v34 = vadd.f32 %v833_v28, %v802_v29 }
 0x1ff   : > { %v867_v9 = vpop.permute.xlu1 %866 }
 0x200   : > { %v868_v33 = vsel %vm797_vm10, %v865_v22, %v867_v9 }
 0x201   : > { %v872_v37 = vadd.f32 %v868_v33, %v837_v34 }
 0x203   : > { %v900_v24 = vpop.permute.xlu0 %899  ;;  %v902_v25 = vpop.permute.xlu1 %901 }
 0x204   : > { %v903_v36 = vsel %vm797_vm10, %v900_v24, %v902_v25  ;;  %v906_v40 = vadd.f32 %v900_v24, %v871_v35 }
 0x205   : > { %v907_v42 = vadd.f32 %v903_v36, %v872_v37 }
 0x207   : > { %v938_v30 = vpop.permute.xlu1 %937  ;;  %v936_v32 = vpop.permute.xlu0 %935 }
 0x208   : > { %v940_v41 = vsel %vm939_vm11, %v936_v32, %v938_v30  ;;  %v943_v43 = vadd.f32 %v936_v32, %v906_v40 }
 0x209   : > { %v944_v45 = vadd.f32 %v940_v41, %v907_v42 }
 0x20b   : > { %v974_v38 = vpop.permute.xlu1 %973  ;;  %v972_v39 = vpop.permute.xlu0 %971 }
 0x20c   : > { %v975_v44 = vsel %vm939_vm11, %v972_v39, %v974_v38  ;;  %v978_v51 = vadd.f32 %v972_v39, %v943_v43 }
 0x20d   : > { %v979_v56 = vadd.f32 %v975_v44, %v944_v45 }
 0x20f   : > { %v1009_v49 = vpop.permute.xlu1 %1008  ;;  %v1007_v50 = vpop.permute.xlu0 %1006 }
 0x210   : > { %v1010_v55 = vsel %vm939_vm11, %v1007_v50, %v1009_v49  ;;  %v1013_v57 = vadd.f32 %v1007_v50, %v978_v51 }
 0x211   : > { %v1014_v58 = vadd.f32 %v1010_v55, %v979_v56 }
 0x213   : > { %v1044_v47 = vpop.permute.xlu1 %1043  ;;  %v1042_v15 = vpop.permute.xlu0 %1041 }
 0x214   : > { %v1045_v59 = vsel %vm939_vm11, %v1042_v15, %v1044_v47  ;;  %v1048_v60 = vadd.f32 %v1042_v15, %v1013_v57 }
 0x215   : > { %v1049_v62 = vadd.f32 %v1045_v59, %v1014_v58 }
 0x216   : > { %1052 = vrot.lane.b32.xlu0 %v1048_v60, %s1744_s16  ;;  %v1072_v63 = vmul.f32 %v1048_v60, %v1048_v60 }
 0x217   : > { %1054 = vrot.lane.b32.xlu1 %v1049_v62, %s1744_s16  ;;  %v1073_v11 = vmul.f32 %v1049_v62, %v1049_v62 }
 0x21a   : > { %1076 = vrot.lane.b32.xlu0 %v1072_v63, %s1744_s16 }
 0x21b   : > { %1078 = vrot.lane.b32.xlu1 %v1073_v11, %s1744_s16 }
 0x288   : > { %v1053_v17 = vpop.permute.xlu0 %1052 }
 0x289   : > { %v1055_v31 = vpop.permute.xlu1 %1054 }
 0x28a   : > { %v1057_v0 = vsel %vm1056_vm12, %v1053_v17, %v1055_v31 }
 0x28b   : > { %v1059_v46 = vsel %vm476_vm1, %v1057_v0, 0.0 }
 0x28c   : > { %v1077_v53 = vpop.permute.xlu0 %1076  ;;  %1060 = vadd.xlane.f32.xlu0 %v1059_v46 }
 0x28d   : > { %v1079_v1 = vpop.permute.xlu1 %1078 }
 0x28e   : > { %v1080_v2 = vsel %vm1056_vm12, %v1077_v53, %v1079_v1 }
 0x28f   : > { %v1082_v3 = vsel %vm476_vm1, %v1080_v2, 0.0 }
 0x290   : > { %1083 = vadd.xlane.f32.xlu1 %v1082_v3 }
 0x315   : > { %v1061_v7 = vpop.xlane.xlu0 %1060 }
 0x316   : > { %v1068_v48 = vrot.slane %v1061_v7, %v1067_v6 }
 0x318   : > { %1071 = vst.msk [vmem:[%s462_s12] sm:$0x1] %vm1070_vm13, %v1068_v48 }
 0x319   : > { %v1084_v54 = vpop.xlane.xlu1 %1083 }
 0x31a   : > { %1610 = shalt.err (!%p1607_p1)
}
 0x31b   : > { %s1611_s20 = scalar_lea.hbm %s2138_s15, 16  ;;  %s1615_s27 = scalar_lea.hbm %s2221_s7, 32 }
 0x31c   : > { %p1612_p4 = scmp.ne.s32.totalorder %s2138_s15, %s1611_s20  ;;  %p1616_p11 = scmp.lt.s32.totalorder %s2138_s15, %s2221_s7 }
 0x31d   : > { %p1617_p12 = scmp.lt.s32.totalorder %s1615_s27, %s1611_s20 }
 0x31e   : > { %p1613_p6 = pnand %p1612_p4, %p2261_p2 }
 0x31f   : > { %p1618_p13 = por %p1617_p12, %p1616_p11 }
 0x320   : > { %p1614_p8 = pneg %p1613_p6 }
 0x322   : > { %p1619_p10 = pnand %p1618_p13, %p1614_p8 }
 0x324   : > { %1622 = shalt.err (!%p1619_p10)
}
 0x325   : > { %1327 = dma.vmem_to_hbm [thread:$0]  (%p2261_p2), %s2140_s9, 16, %s2138_s15, %s1093_s13   ;;  %v1089_v61 = vrot.slane %v1084_v54, %v1067_v6 }
 0x326   : > { %s1122_s17 = scalar_lea.hbm %s2222_s8, %s1309_s24  ;;  %s1097_s18 = scalar_lea.sflag [#allocation14], %s1951_s19 }
 0x327   : > { %1091 = vst.msk [vmem:[%s468_s21] sm:$0x1] %vm1070_vm13, %v1089_v61  ;;  %s1623_s4 = scalar_lea.vmem %s1125_s11, 16  ;;  %s1746_s10 = smov [#allocation13]  }
 0x328   : > { %p1624_p3 = scmp.ne.s32.totalorder %s1125_s11, %s1623_s4  ;;  %s1627_s22 = sshll.u32 %s1746_s10, 4  ;;  %s1628_s22 = int_to_ptr.vmem [resolvable:$false] %s1627_s22 }
 0x329   : > { %s1629_s9 = scalar_lea.vmem %s1628_s22, 32  ;;  %p1630_p0 = scmp.lt.s32.totalorder %s1125_s11, %s1628_s22 }
 0x32a   : > { %p1625_p7 = pnand %p1624_p3, %p2261_p2  ;;  %p1631_p5 = scmp.lt.s32.totalorder %s1629_s9, %s1623_s4 }
 0x32c   : > { %p1626_p9 = pneg %p1625_p7  ;;  %p1632_p1 = por %p1631_p5, %p1630_p0 }
 0x32e   : > { %p1633_p4 = pnand %p1632_p1, %p1626_p9 }
 0x330   : > { %1636 = shalt.err (!%p1633_p4)
}
 0x331   : > { %s1637_s30 = scalar_lea.hbm %s1122_s17, 16  ;;  %s1641_s15 = scalar_lea.hbm %s2222_s8, 32 }
 0x332   : > { %p1638_p6 = scmp.ne.s32.totalorder %s1122_s17, %s1637_s30  ;;  %p1642_p12 = scmp.lt.s32.totalorder %s1122_s17, %s2222_s8 }
 0x333   : > { %p1643_p13 = scmp.lt.s32.totalorder %s1641_s15, %s1637_s30 }
 0x334   : > { %p1639_p8 = pnand %p1638_p6, %p2261_p2 }
 0x335   : > { %p1644_p10 = por %p1643_p13, %p1642_p12 }
 0x336   : > { %p1640_p11 = pneg %p1639_p8 }
 0x338   : > { %p1645_p3 = pnand %p1644_p10, %p1640_p11 }
 0x33a   : > { %1648 = shalt.err (!%p1645_p3)
}
 0x33b   : > { %1328 = dma.vmem_to_hbm [thread:$0]  (%p2261_p2), %s1125_s11, 16, %s1122_s17, %s1097_s18  }
 0x33c PF: > { %s2262_s20 = sld [smem:[#allocation20_spill]] }
 0x33d   : > { %s2263_s23 = sld [smem:[#allocation23_spill]] }
 0x33e   : > { %s2264_s26 = sld [smem:[#allocation22_spill]] }
 0x342   : > { %s1136_s27 = sand.u32 1, %s2262_s20  }
 0x343   : > { %p2265_p7 = scmp.ne.s32.totalorder %s2263_s23, 0  ;;  %s1137_s1 = scalar_lea.sflag [#allocation5], %s1136_s27 }
 0x344   : > { %p2266_p9 = scmp.ge.s32.totalorder %s2264_s26, 2 }
 0x346   : > { %p1349_p0 = pnand %p2266_p9, %p2265_p7 }
 0x348   : > { %p1350_p5 = pneg %p1349_p0 }
 0x34a   : > { %1686 = dma.done.wait (%p1350_p5), %s1137_s1, 16  }
 0x34b   : > { %1688 = vsyncadd (%p1350_p5), %s1137_s1, 4294967280  ;;  %s1145_s16 = scalar_lea.sflag [#allocation14], %s1136_s27 }
 0x34c   : > { %1690 = dma.done.wait (%p1350_p5), %s1145_s16, 16  }
 0x34d   : > { %1692 = vsyncadd (%p1350_p5), %s1145_s16, 4294967280  ;;  %s32_s10 = sadd.s32 1, %s2264_s26   ;;  %s2267_s25 = sld [smem:[#allocation25_spill]] }
 0x34e   : > { %p29_p1 = scmp.ge.s32.totalorder %s32_s10, 4   ;;  %s2268_s30 = sld [smem:[#allocation21_spill]] }
 0x34f   : > { %s2269_s9 = sld [smem:[#allocation24_spill]]  ;;  %s2270_s27 = smov %s1699_s28 }
 0x350   : > { %s2271_s28 = smov %s1703_s29  ;;  %31 = sbr.rel (!%p29_p1) target bundleno = 14 (0xe), region = 142 }
 0x353   : > { %s2272_s29 = smov %s2267_s25 }
 0x355   :  { %1149 = vsyncpa [#allocation4], 1 }
 0x356   :  { %1151 = vsyncpa [#allocation4 + $0x1], 1 }
 0x357   :  { %1152 = vsyncpa [#allocation7], 1 }
 0x358   :  { %1154 = vsyncpa [#allocation7 + $0x1], 1 }
 0x359   :  { %1155 = vsyncpa [#allocation10], 1 }
 0x35a   :  { %1156 = vsyncpa [#allocation5], 1 }
 0x35b   :  { %1158 = vsyncpa [#allocation5 + $0x1], 1 }
 0x35c   :  { %1159 = vsyncpa [#allocation14], 1 }
 0x35d   :  { %1161 = vsyncpa [#allocation14 + $0x1], 1 }

</bundles_post_ra>
